<compile_context>
chip_gen: v5e
topology: v5e:2x2
jax: 0.10.0
libtpu: 0.0.40
codegen_flags: <defaults>
</compile_context>

<pallas_src>
import math
import numpy as np
import jax
import jax.numpy as jnp
from jax.experimental import pallas as pl
from jax.experimental.pallas import tpu as pltpu

ACT_QMIN, ACT_QMAX = 0.0, 255.0      # quint8 activations (qnnpack, reduce_range=False)
W_QMIN, W_QMAX = -128.0, 127.0       # qint8 symmetric weights
EPS = 1.1920929e-07                  # torch.finfo(float32).eps
LANE = 128


def _round_up(a, b):
    return (a + b - 1) // b * b


def _cdiv(a, b):
    return (a + b - 1) // b


# ---------------------------------------------------------------------------
# fake-quant / observer math (matches torch fake_quantize + MinMaxObserver).
# The same helpers are used for kernel-input prep and in the pure-JAX reference,
# so the two paths are op-for-op identical.
# ---------------------------------------------------------------------------
def _quantize_act(x, inv_scale, zp):
    """quint8 affine: integer-valued (q - zp) in [-255, 255], kept in float."""
    q = jnp.clip(jnp.round(x * inv_scale + zp), ACT_QMIN, ACT_QMAX)
    return q - zp


def _quantize_weight(w, inv_scale):
    """qint8 symmetric: integer-valued q in [-128, 127], kept in float."""
    return jnp.clip(jnp.round(w * inv_scale), W_QMIN, W_QMAX)


def _act_qparams_from_minmax(mn, mx):
    mn = jnp.minimum(mn.astype(jnp.float32), 0.0)
    mx = jnp.maximum(mx.astype(jnp.float32), 0.0)
    scale = jnp.maximum((mx - mn) / (ACT_QMAX - ACT_QMIN), EPS)
    zp = jnp.clip(ACT_QMIN - jnp.round(mn / scale), ACT_QMIN, ACT_QMAX)
    return scale, zp, 1.0 / scale


def _act_qparams(x):
    return _act_qparams_from_minmax(jnp.min(x), jnp.max(x))


def _weight_qparams(w):
    mn = jnp.minimum(jnp.min(w), 0.0).astype(jnp.float32)
    mx = jnp.maximum(jnp.max(w), 0.0).astype(jnp.float32)
    amax = jnp.maximum(-mn, mx)
    scale = jnp.maximum(amax / ((W_QMAX - W_QMIN) / 2.0), EPS)
    return scale, 1.0 / scale


# ---------------------------------------------------------------------------
# Pallas kernel: implicit-KH conv (KH matmuls over overlapping slab windows)
# + scale + bias + fused output-range observer (per-tile min/max).
# ---------------------------------------------------------------------------
def _make_conv_obs_kernel(KH, W, HB, H, Cout, Cout_mx, num_h_tiles):
    HBW = HB * W
    needs_cout_slice = (Cout != Cout_mx)
    needs_mask = (H % HB) != 0           # only then does the last h-tile hold pad rows

    def kernel(qp_ref, a_ref, w_ref, b_ref, y_ref, mn_ref, mx_ref):
        # qp_ref (SMEM, scalar prefetch): [sx * sw]
        scale_xw = qp_ref[0]

        # a_ref: (1, (HB+KH-1)*W, KW*C) bf16 integer codes, pre-quantized in the
        # wrapper.  Tap row i uses slab rows [i*W, i*W + HB*W): the KH overlapping
        # windows replace the materialized im2col.  Integer products/sums are exact
        # in the f32 MXU accumulator for the sizes handled here.
        acc = jnp.dot(a_ref[0, 0:HBW, :], w_ref[0],
                      preferred_element_type=jnp.float32)
        for i in range(1, KH):
            acc = acc + jnp.dot(a_ref[0, i * W:i * W + HBW, :], w_ref[i],
                                preferred_element_type=jnp.float32)

        y = acc * scale_xw + b_ref[...]
        if needs_cout_slice:
            y = y[:, :Cout]               # narrow-Cout: don't write padded lanes to HBM
        y_ref[...] = y

        # Fused output observer (per-tile min/max).  Padded Cout lanes were already
        # dropped; padded h-rows (bias-only) are masked below, but ONLY on the last
        # h-tile of each image (pl.when-gated -> other tiles pay nothing).  The quint8
        # observer clamps with 0 anyway, so substituting 0.0 is exact.
        mn_ref[...] = jnp.full(mn_ref.shape, jnp.min(y), dtype=jnp.float32)
        mx_ref[...] = jnp.full(mx_ref.shape, jnp.max(y), dtype=jnp.float32)

        if needs_mask:
            ht = pl.program_id(0) % num_h_tiles

            @pl.when(ht == num_h_tiles - 1)
            def _():
                h0 = (num_h_tiles - 1) * HB
                valid_rows = (H - h0) * W                      # static python int
                row = jax.lax.broadcasted_iota(jnp.int32, y.shape, 0)
                ym = jnp.where(row < valid_rows, y, 0.0)
                mn_ref[...] = jnp.full(mn_ref.shape, jnp.min(ym), dtype=jnp.float32)
                mx_ref[...] = jnp.full(mx_ref.shape, jnp.max(ym), dtype=jnp.float32)

    return kernel


# ---------------------------------------------------------------------------
# Wrapper: observers, one-shot quantization, slab prep, pallas_call, epilogue.
# ---------------------------------------------------------------------------
def qat_conv2d_forward(x_nchw, weight, bias, *, hb=None, target_rows=512, min_grid=4):
    """fq_act(conv2d(fq_act(x), fq_weight(w)) + b); stride 1, 'same' padding, NCHW."""
    N, C, H, W = x_nchw.shape
    Cout, Cin, KH, KW = weight.shape
    assert Cin == C and KH % 2 == 1 and KW % 2 == 1
    ph, pw = KH // 2, KW // 2

    # -- observers ("first QAT forward": observe, then fake-quant) -------------
    sx, zx, inv_sx = _act_qparams(x_nchw)
    sw, inv_sw = _weight_qparams(weight)
    scale_xw = (sx * sw).astype(jnp.float32)

    # -- h-tile size: HB output rows per grid step ------------------------------
    # constraint: HB*W % 8 == 0 (output-block sublane dim); keep >= min_grid steps
    # so the "parallel" axis shards across v7x's two TensorCores.
    hb_align = 8 // math.gcd(W, 8)
    if hb is None:
        hb = max(hb_align, (max(target_rows // W, 1)) // hb_align * hb_align)
        hb = min(hb, _round_up(H, hb_align))
        while hb > hb_align and N * _cdiv(H, hb) < min_grid:
            hb = max(hb_align, (hb // 2) // hb_align * hb_align)
    else:
        hb = max(hb_align, _round_up(hb, hb_align))
    HB = hb
    num_h_tiles = _cdiv(H, HB)
    H_out_pad = num_h_tiles * HB
    SH = HB + KH - 1                      # slab rows (h) per tile, overlap = KH-1
    HBW = HB * W
    grid = N * num_h_tiles

    KWC = KW * C
    Cout_mx = _round_up(Cout, LANE)       # MXU-side N dim stays lane-dense

    # -- weight fake-quant hoisted out of the grid loop (done once, here) ------
    # layout (KH, KW*C, Cout_mx): tap-row i, contraction over (kw, cin), bf16 codes.
    qw = _quantize_weight(weight, inv_sw)                               # (Cout,C,KH,KW)
    w_mat = jnp.transpose(qw, (2, 3, 1, 0)).reshape(KH, KWC, Cout)
    w_mat = jnp.pad(w_mat, ((0, 0), (0, 0), (0, Cout_mx - Cout))).astype(jnp.bfloat16)
    b_row = jnp.pad(bias.astype(jnp.float32), (0, Cout_mx - Cout)).reshape(1, Cout_mx)

    # -- activations: fake-quant ONCE to bf16 integer codes (exact: |code|<=255),
    #    zero-pad (fq(0)=0 so this equals padding before fake-quant), expand only
    #    along KW, then pre-gather per-tile H-slabs (overlap KH-1 rows per tile).
    #    Total A-side HBM traffic ~ KW * bf16 instead of KH*KW * f32.
    x_nhwc = jnp.transpose(x_nchw, (0, 2, 3, 1))
    xq = _quantize_act(x_nhwc, inv_sx, zx).astype(jnp.bfloat16)         # (N,H,W,C)
    Hp = H_out_pad + KH - 1
    xq = jnp.pad(xq, ((0, 0), (ph, Hp - H - ph), (pw, pw), (0, 0)))     # (N,Hp,W+KW-1,C)
    xq = jnp.concatenate([xq[:, :, j:j + W, :] for j in range(KW)], axis=-1)  # (N,Hp,W,KWC)
    slabs = jnp.stack([xq[:, t * HB:t * HB + SH] for t in range(num_h_tiles)],
                      axis=1)                                           # (N,T,SH,W,KWC)
    slabs = slabs.reshape(grid, SH * W, KWC)
    # TODO(synk): fully-implicit variant (raw NHWC in HBM + manual overlapping-slab DMA)
    # would also remove this single bf16 materialization pass.

    qp = jnp.reshape(scale_xw, (1,))

    kernel = _make_conv_obs_kernel(KH, W, HB, H, Cout, Cout_mx, num_h_tiles)
    y_mat, mn_t, mx_t = pl.pallas_call(
        kernel,
        out_shape=(
            jax.ShapeDtypeStruct((grid * HBW, Cout), jnp.float32),      # conv result
            jax.ShapeDtypeStruct((grid, 8, LANE), jnp.float32),         # per-tile min
            jax.ShapeDtypeStruct((grid, 8, LANE), jnp.float32),         # per-tile max
        ),
        grid_spec=pltpu.PrefetchScalarGridSpec(
            num_scalar_prefetch=1,
            grid=(grid,),
            in_specs=[
                pl.BlockSpec((1, SH * W, KWC), lambda t, qp: (t, 0, 0)),      # slab
                pl.BlockSpec((KH, KWC, Cout_mx), lambda t, qp: (0, 0, 0)),    # resident w
                pl.BlockSpec((1, Cout_mx), lambda t, qp: (0, 0)),             # resident b
            ],
            out_specs=[
                pl.BlockSpec((HBW, Cout), lambda t, qp: (t, 0)),
                pl.BlockSpec((1, 8, LANE), lambda t, qp: (t, 0, 0)),
                pl.BlockSpec((1, 8, LANE), lambda t, qp: (t, 0, 0)),
            ],
        ),
        compiler_params=pltpu.CompilerParams(
            dimension_semantics=("parallel",),
            vmem_limit_bytes=40 * 1024 * 1024,   # fits v7x's 64 MiB with headroom
        ),
    )(qp, slabs, w_mat, b_row)

    # output-activation qparams from the fused per-tile min/max (no HBM re-read of y)
    sy, zy, inv_sy = _act_qparams_from_minmax(jnp.min(mn_t), jnp.max(mx_t))

    # output fake-quant as plain jnp so XLA fuses it into the NHWC->NCHW transpose:
    # one read of y, one write of the output (the second pallas pass was dropped).
    y = y_mat.reshape(N, H_out_pad, W, Cout)[:, :H]
    out = _quantize_act(y, inv_sy, zy) * sy
    return jnp.transpose(out, (0, 3, 1, 2))


# ---------------------------------------------------------------------------
# pure-JAX reference of the same QAT forward
# ---------------------------------------------------------------------------
def _reference(x, w, b):
    """Algebraically identical factored form (integer codes, single sx*sw scaling)."""
    sx, zx, inv_sx = _act_qparams(x)
    sw, inv_sw = _weight_qparams(w)
    qx = _quantize_act(x, inv_sx, zx)
    qw = _quantize_weight(w, inv_sw)
    kh, kw = w.shape[2], w.shape[3]
    y = jax.lax.conv_general_dilated(
        qx, qw, window_strides=(1, 1),
        padding=((kh // 2, kh // 2), (kw // 2, kw // 2)),
        dimension_numbers=("NCHW", "OIHW", "NCHW"))
    y = y * (sx * sw) + b.reshape(1, -1, 1, 1)
    sy, zy, inv_sy = _act_qparams(y)
    return _quantize_act(y, inv_sy, zy) * sy, sy


def _check(out, ref, out_scale):
    out = np.asarray(out)
    ref = np.asarray(ref)
    err = np.abs(out - ref)
    lsb = float(out_scale)  # one output quantization step
    # integer-exact matmul path: bit-exact agreement expected; a one-LSB flip is only
    # legitimate on an exact round-half tie, anything larger is a real bug.
    assert float(err.max()) <= 1.001 * lsb + 1e-4, float(err.max())
    assert float((err > 1e-4).mean()) <= 0.005, float((err > 1e-4).mean())


# TODO(synk): the epoch-schedule machinery (train()/freeze()/adaptive_freeze_layers,
# observer & BN freezing, convert_fx) is training-time bookkeeping with no forward
# compute; only the QAT forward (fake-quant + conv) is implemented here.

if __name__ == "__main__":
    key = jax.random.PRNGKey(0)
    kx, kw_, kb = jax.random.split(key, 3)
    N, Cin, H, W = 2, 4, 16, 16
    Cout = 8

    x = jax.random.normal(kx, (N, Cin, H, W), jnp.float32)
    weight = jax.random.normal(kw_, (Cout, Cin, 3, 3), jnp.float32) * 0.1
    bias = jax.random.normal(kb, (Cout,), jnp.float32) * 0.01

    out = jax.block_until_ready(qat_conv2d_forward(x, weight, bias))
    ref, sy = _reference(x, weight, bias)
    ref = jax.block_until_ready(ref)
    assert out.shape == (N, Cout, H, W)
    _check(out, ref, sy)

    # different h-tiling (exercises the grid loop, padded output rows + masked
    # observer); tiling must not change the result at all (integer-exact path).
    out_tiled = jax.block_until_ready(qat_conv2d_forward(x, weight, bias, hb=6))
    np.testing.assert_allclose(np.asarray(out_tiled), np.asarray(out), atol=1e-6, rtol=0)

    # odd spatial size + narrow Cout: forces H padding + in-kernel row masking and
    # the narrow-Cout (unpadded y) store path.
    x2 = jax.random.normal(jax.random.PRNGKey(1), (1, 3, 10, 10), jnp.float32)
    w2 = jax.random.normal(jax.random.PRNGKey(2), (5, 3, 3, 3), jnp.float32) * 0.2
    b2 = jax.random.normal(jax.random.PRNGKey(3), (5,), jnp.float32) * 0.05
    out2 = jax.block_until_ready(qat_conv2d_forward(x2, w2, b2))
    ref2, sy2 = _reference(x2, w2, b2)
    assert out2.shape == (1, 5, 10, 10)
    _check(out2, jax.block_until_ready(ref2), sy2)

    print("KERNEL_OK")
</pallas_src>

<mosaic_0001>
module attributes {stable_mosaic.version = 11 : i64} {
  func.func @kernel(%arg0: i32, %arg1: memref<1xf32, #tpu.memory_space<smem>>, %arg2: memref<1x160x12xbf16, #tpu.memory_space<vmem>>, %arg3: memref<3x12x128xbf16, #tpu.memory_space<vmem>>, %arg4: memref<1x128xf32, #tpu.memory_space<vmem>>, %arg5: memref<128x8xf32, #tpu.memory_space<vmem>>, %arg6: memref<1x8x128xf32, #tpu.memory_space<vmem>>, %arg7: memref<1x8x128xf32, #tpu.memory_space<vmem>>) attributes {dimension_semantics = [#tpu.dimension_semantics<parallel>], iteration_bounds = array<i64: 4>, scalar_prefetch = 1 : i64, scratch_operands = 0 : i64, tpu.core_type = #tpu.core_type<tc>, window_params = [{transform_indices = @transform_0, window_bounds = array<i64: 1, 160, 12>}, {pipeline_mode = #tpu.pipeline_mode<synchronous>, transform_indices = @transform_1, window_bounds = array<i64: 3, 12, 128>}, {pipeline_mode = #tpu.pipeline_mode<synchronous>, transform_indices = @transform_2, window_bounds = array<i64: 1, 128>}, {transform_indices = @transform_3, window_bounds = array<i64: 128, 8>}, {transform_indices = @transform_4, window_bounds = array<i64: 1, 8, 128>}, {transform_indices = @transform_5, window_bounds = array<i64: 1, 8, 128>}]} {
    %c0 = arith.constant 0 : index
    %0 = memref.load %arg1[%c0] : memref<1xf32, #tpu.memory_space<smem>>
    %c0_0 = arith.constant 0 : index
    %c0_1 = arith.constant 0 : index
    %c0_2 = arith.constant 0 : index
    %1 = vector.load %arg2[%c0_0, %c0_1, %c0_2] : memref<1x160x12xbf16, #tpu.memory_space<vmem>>, vector<1x128x12xbf16>
    %2 = vector.shape_cast %1 : vector<1x128x12xbf16> to vector<128x12xbf16>
    %c0_3 = arith.constant 0 : index
    %c0_4 = arith.constant 0 : index
    %c0_5 = arith.constant 0 : index
    %3 = vector.load %arg3[%c0_3, %c0_4, %c0_5] : memref<3x12x128xbf16, #tpu.memory_space<vmem>>, vector<1x12x128xbf16>
    %4 = vector.shape_cast %3 : vector<1x12x128xbf16> to vector<12x128xbf16>
    %cst = arith.constant dense<0.000000e+00> : vector<128x128xf32>
    %5 = tpu.matmul %2, %4, %cst {dimension_numbers = #tpu.dot_dimension_numbers<[1], [0], [0], [1], [0, 0, 1, 1], [], []>} : vector<128x12xbf16>, vector<12x128xbf16>, vector<128x128xf32> -> vector<128x128xf32>
    %c0_6 = arith.constant 0 : index
    %c16 = arith.constant 16 : index
    %c0_7 = arith.constant 0 : index
    %6 = vector.load %arg2[%c0_6, %c16, %c0_7] : memref<1x160x12xbf16, #tpu.memory_space<vmem>>, vector<1x128x12xbf16>
    %7 = vector.shape_cast %6 : vector<1x128x12xbf16> to vector<128x12xbf16>
    %c1 = arith.constant 1 : index
    %c0_8 = arith.constant 0 : index
    %c0_9 = arith.constant 0 : index
    %8 = vector.load %arg3[%c1, %c0_8, %c0_9] : memref<3x12x128xbf16, #tpu.memory_space<vmem>>, vector<1x12x128xbf16>
    %9 = vector.shape_cast %8 : vector<1x12x128xbf16> to vector<12x128xbf16>
    %cst_10 = arith.constant dense<0.000000e+00> : vector<128x128xf32>
    %10 = tpu.matmul %7, %9, %cst_10 {dimension_numbers = #tpu.dot_dimension_numbers<[1], [0], [0], [1], [0, 0, 1, 1], [], []>} : vector<128x12xbf16>, vector<12x128xbf16>, vector<128x128xf32> -> vector<128x128xf32>
    %11 = arith.addf %5, %10 : vector<128x128xf32>
    %c0_11 = arith.constant 0 : index
    %c32 = arith.constant 32 : index
    %c0_12 = arith.constant 0 : index
    %12 = vector.load %arg2[%c0_11, %c32, %c0_12] : memref<1x160x12xbf16, #tpu.memory_space<vmem>>, vector<1x128x12xbf16>
    %13 = vector.shape_cast %12 : vector<1x128x12xbf16> to vector<128x12xbf16>
    %c2 = arith.constant 2 : index
    %c0_13 = arith.constant 0 : index
    %c0_14 = arith.constant 0 : index
    %14 = vector.load %arg3[%c2, %c0_13, %c0_14] : memref<3x12x128xbf16, #tpu.memory_space<vmem>>, vector<1x12x128xbf16>
    %15 = vector.shape_cast %14 : vector<1x12x128xbf16> to vector<12x128xbf16>
    %cst_15 = arith.constant dense<0.000000e+00> : vector<128x128xf32>
    %16 = tpu.matmul %13, %15, %cst_15 {dimension_numbers = #tpu.dot_dimension_numbers<[1], [0], [0], [1], [0, 0, 1, 1], [], []>} : vector<128x12xbf16>, vector<12x128xbf16>, vector<128x128xf32> -> vector<128x128xf32>
    %17 = arith.addf %11, %16 : vector<128x128xf32>
    %18 = vector.broadcast %0 : f32 to vector<128x128xf32>
    %19 = arith.mulf %17, %18 : vector<128x128xf32>
    %c0_16 = arith.constant 0 : index
    %c0_17 = arith.constant 0 : index
    %20 = vector.load %arg4[%c0_16, %c0_17] : memref<1x128xf32, #tpu.memory_space<vmem>>, vector<1x128xf32>
    %21 = vector.broadcast %20 : vector<1x128xf32> to vector<128x128xf32>
    %22 = arith.addf %19, %21 : vector<128x128xf32>
    %23 = vector.extract_strided_slice %22 {offsets = [0, 0], sizes = [128, 8], strides = [1, 1]} : vector<128x128xf32> to vector<128x8xf32>
    %c0_18 = arith.constant 0 : index
    %c0_19 = arith.constant 0 : index
    %24 = vector.load %arg5[%c0_18, %c0_19] : memref<128x8xf32, #tpu.memory_space<vmem>>, vector<128x8xf32>
    tpu.vector_store %arg5[%c0_18, %c0_19], %23 {strides = array<i32>} : memref<128x8xf32, #tpu.memory_space<vmem>>, vector<128x8xf32>,
    %25 = vector.shape_cast %23 : vector<128x8xf32> to vector<1x128x8xf32>
    %cst_20 = arith.constant dense<0x7F800000> : vector<1xf32>
    %26 = vector.multi_reduction <minimumf>, %25, %cst_20 [1, 2] : vector<1x128x8xf32> to vector<1xf32>
    %27 = vector.shape_cast %26 : vector<1xf32> to vector<1x1x1xf32>
    %28 = vector.extract %27[0, 0, 0] : f32 from vector<1x1x1xf32>
    %29 = vector.broadcast %28 : f32 to vector<1x8x128xf32>
    %c0_21 = arith.constant 0 : index
    %c0_22 = arith.constant 0 : index
    %c0_23 = arith.constant 0 : index
    %30 = vector.load %arg6[%c0_21, %c0_22, %c0_23] : memref<1x8x128xf32, #tpu.memory_space<vmem>>, vector<1x8x128xf32>
    tpu.vector_store %arg6[%c0_21, %c0_22, %c0_23], %29 {strides = array<i32>} : memref<1x8x128xf32, #tpu.memory_space<vmem>>, vector<1x8x128xf32>,
    %31 = vector.shape_cast %23 : vector<128x8xf32> to vector<1x128x8xf32>
    %cst_24 = arith.constant dense<0xFF800000> : vector<1xf32>
    %32 = vector.multi_reduction <maximumf>, %31, %cst_24 [1, 2] : vector<1x128x8xf32> to vector<1xf32>
    %33 = vector.shape_cast %32 : vector<1xf32> to vector<1x1x1xf32>
    %34 = vector.extract %33[0, 0, 0] : f32 from vector<1x1x1xf32>
    %35 = vector.broadcast %34 : f32 to vector<1x8x128xf32>
    %c0_25 = arith.constant 0 : index
    %c0_26 = arith.constant 0 : index
    %c0_27 = arith.constant 0 : index
    %36 = vector.load %arg7[%c0_25, %c0_26, %c0_27] : memref<1x8x128xf32, #tpu.memory_space<vmem>>, vector<1x8x128xf32>
    tpu.vector_store %arg7[%c0_25, %c0_26, %c0_27], %35 {strides = array<i32>} : memref<1x8x128xf32, #tpu.memory_space<vmem>>, vector<1x8x128xf32>,
    return
  }
  func.func @transform_0(%arg0: i32, %arg1: memref<1xf32, #tpu.memory_space<smem>>) -> (i32, i32, i32) {
    %c0_i32 = arith.constant 0 : i32
    %c0_i32_0 = arith.constant 0 : i32
    %c0_i32_1 = arith.constant 0 : i32
    return %arg0, %c0_i32, %c0_i32_0 : i32, i32, i32
  }
  func.func @transform_1(%arg0: i32, %arg1: memref<1xf32, #tpu.memory_space<smem>>) -> (i32, i32, i32) {
    %c0_i32 = arith.constant 0 : i32
    %c0_i32_0 = arith.constant 0 : i32
    %c0_i32_1 = arith.constant 0 : i32
    %c0_i32_2 = arith.constant 0 : i32
    return %c0_i32, %c0_i32_0, %c0_i32_1 : i32, i32, i32
  }
  func.func @transform_2(%arg0: i32, %arg1: memref<1xf32, #tpu.memory_space<smem>>) -> (i32, i32) {
    %c0_i32 = arith.constant 0 : i32
    %c0_i32_0 = arith.constant 0 : i32
    %c0_i32_1 = arith.constant 0 : i32
    return %c0_i32, %c0_i32_0 : i32, i32
  }
  func.func @transform_3(%arg0: i32, %arg1: memref<1xf32, #tpu.memory_space<smem>>) -> (i32, i32) {
    %c0_i32 = arith.constant 0 : i32
    %c0_i32_0 = arith.constant 0 : i32
    return %arg0, %c0_i32 : i32, i32
  }
  func.func @transform_4(%arg0: i32, %arg1: memref<1xf32, #tpu.memory_space<smem>>) -> (i32, i32, i32) {
    %c0_i32 = arith.constant 0 : i32
    %c0_i32_0 = arith.constant 0 : i32
    %c0_i32_1 = arith.constant 0 : i32
    return %arg0, %c0_i32, %c0_i32_0 : i32, i32, i32
  }
  func.func @transform_5(%arg0: i32, %arg1: memref<1xf32, #tpu.memory_space<smem>>) -> (i32, i32, i32) {
    %c0_i32 = arith.constant 0 : i32
    %c0_i32_0 = arith.constant 0 : i32
    %c0_i32_1 = arith.constant 0 : i32
    return %arg0, %c0_i32, %c0_i32_0 : i32, i32, i32
  }
}

</mosaic_0001>

<bundles_post_ra>
// kernel: tpu_custom_call.1
= control target key start
LH: loop header
LB: loop body
LE: loop exit
PB: predicated region body
PF: predicated region fallthrough
CT: control target
= control target key end

     0   :  { %s1568_s0 = inlined_call_operand.<no memory space> [shape: f32[1], index: 0, kind: input, shape index: {}]   ;;  %s1569_s1 = inlined_call_operand.vmem [shape: bf16[4,160,12], index: 1, kind: input, shape index: {}]   ;;  %s1570_s2 = inlined_call_operand.vmem [shape: bf16[3,12,128], index: 2, kind: input, shape index: {}]   ;;  %s1571_s3 = inlined_call_operand.vmem [shape: f32[1,128], index: 3, kind: input, shape index: {}]   ;;  %s1572_s4 = inlined_call_operand.vmem [shape: f32[512,8], index: 4, kind: output, shape index: {0}]   ;;  %s1573_s5 = inlined_call_operand.hbm [shape: f32[4,8,128], index: 5, kind: output, shape index: {1}]   ;;  %s1574_s6 = inlined_call_operand.hbm [shape: f32[4,8,128], index: 6, kind: output, shape index: {2}]  }
   0x1   :  { %1575 = sst [smem:[#allocation10_spill]] %s1569_s1 }
   0x2   :  { %12 = sst [smem:[#allocation3]] %s1568_s0 }
   0x3   :  { %13 = vsyncpa [#allocation5], 0 }
   0x4   :  { %15 = vsyncpa [#allocation5 + $0x1], 0 }
   0x5   :  { %16 = vsyncpa [#allocation7], 0 }
   0x6   :  { %18 = vsyncpa [#allocation7 + $0x1], 0  ;;  %s1247_s23 = smov 0   ;;  %s1249_s24 = smov 0  }
   0x7   :  { %s1251_s25 = smov 0   ;;  %s1253_s26 = smov 0  }
   0x8 LB: > { %s1268_s0 = sadd.s32 4294967295, %s1207_s26   ;;  %s917_s27 = sadd.s32 4294967294, %s1207_s26   ;;  %s1207_s26 = sphi %s1253_s26, %s1582_s26   ;;  %s1203_s25 = sphi %s1251_s25, %s1581_s25   ;;  %s1199_s24 = sphi %s1249_s24, %s1580_s24   ;;  %s1195_s23 = sphi %s1247_s23, %s1579_s23  }
   0x9   : > { %s1272_s28 = sadd.s32 1, %s1207_s26   ;;  %s125_s29 = sadd.s32 1, %s1203_s25 }
   0xa   : > { %s122_s30 = ssub.s32 %s1207_s26, %s1272_s28  ;;  %p135_p0 = scmp.ne.s32.totalorder %s1203_s25, %s1199_s24 }
   0xb   : > { %p123_p1 = scmp.eq.s32.totalorder %s122_s30, 0  ;;  %p136_p2 = scmp.eq.s32.totalorder %s1268_s0, 3 }
   0xc   : > { %p141_p3 = scmp.ne.s32.totalorder %s1199_s24, %s1195_s23  ;;  %p142_p4 = scmp.eq.s32.totalorder %s917_s27, 3 }
   0xd   : > { %s1283_s7 = scalar_select %p123_p1, %s1203_s25, %s125_s29  }
   0xe   : > { %p1285_p5 = por %p136_p2, %p135_p0  ;;  %p1289_p6 = por %p142_p4, %p141_p3 }
   0xf   : > { %p920_p7 = scmp.ge.s32.totalorder %s1207_s26, 1  ;;  %p200_p8 = scmp.lt.s32.totalorder %s1207_s26, 5 }
  0x11   : > { %p201_p9 = pnand %p920_p7, %p200_p8 }
  0x12   : > { %p238_p10 = scmp.lt.s32.totalorder (!%p201_p9), %s1268_s0, 3  ;;  %s1578_s1 = sld [smem:[#allocation10_spill]] (!%p201_p9) }
  0x13   : > { %204 = sbr.rel (%p201_p9) target bundleno = 464 (0x1d0), region = 32  ;;  %s924_s11 = sshll.u32 (!%p201_p9), %s1268_s0, 4 }
  0x14   : > { %s250_s12 = sld [smem:[#allocation3]] (!%p201_p9)  ;;  %p244_p11 = scmp.lt.s32.totalorder (!%p201_p9), %s924_s11, 63 }
  0x15   : > { %s1519_s19 = sand.u32 (!%p201_p9), 1, %s1199_s24   ;;  %s1036_s20 = sshll.u32 (!%p201_p9), %s1268_s0, 3 }
  0x16   : > { %s921_s21 = sshll.u32 (!%p201_p9), %s1519_s19, 3  ;;  %s781_s29 = scalar_lea.hbm (!%p201_p9), %s1573_s5, %s1036_s20 }
  0x17   : > { %s230_s30 = scalar_lea.vmem (!%p201_p9), [#allocation4], %s921_s21  ;;  %s795_s15 = scalar_lea.hbm (!%p201_p9), %s1574_s6, %s1036_s20 }
  0x18   : > { %v962_v0 = vld [vmem:[%s1570_s2 + $0x8] sm:$0xf]  ;;  %v1050_v1 = vld [vmem:[%s1570_s2 + $0x8] sm:$0x30]  ;;  %vm344_vm0 = vcmask 1045504   ;;  %s239_s22 = scalar_select %p238_p10, %s1268_s0, 3 }
  0x19   : > { %v963_v2 = vor.u32 %v1050_v1, %v962_v0  ;;  %v978_v3 = vld [vmem:[%s1570_s2] sm:$0xf]  ;;  %v1048_v4 = vld [vmem:[%s1570_s2] sm:$0x30]  ;;  %v1024_v5 = vld [vmem:[%s1570_s2 + $0x10] sm:$0xf] }
  0x1a   : > { %v979_v6 = vor.u32 %v1048_v4, %v978_v3  ;;  %v1059_v7 = vld [vmem:[%s1570_s2 + $0x10] sm:$0x30]  ;;  %s1063_s27 = smul.u32 80, %s239_s22  ;;  %vm319_vm1 = vcmask 97280   ;;  %s1584_s11 = smov (!%p244_p11, %s924_s11), 63  ;;  %v1367_v34 = vstv %s250_s12  ;;  %vm655_vm2 = vcmask 64512  }
  0x1b   : > { %v346_v8 = vsel %vm344_vm0, %v963_v2, 0  ;;  %v1025_v9 = vor.u32 %v1059_v7, %v1024_v5  ;;  %s925_s13 = sshll.u32 %s1584_s11, 3  ;;  %v1372_v36 = vld [vmem:[%s1571_s3] ss:$0 sm:$0xff]  ;;  %s785_s11 = sshll.u32 %s781_s29, 4  ;;  %s786_s11 = int_to_ptr.hbm [resolvable:$true] %s785_s11 }
  0x1c   : > { %355 = vmatpush.bf16.msra.mxu0 %v346_v8  ;;  %1060 = vmatpush.bf16.msra.mxu3 %v346_v8  ;;  %v411_v10 = vsel %vm344_vm0, %v979_v6, 0  ;;  %s1321_s10 = scalar_lea.vmem %s1578_s1, %s1063_s27  ;;  %s1378_s18 = scalar_lea.vmem %s1572_s4, %s925_s13 }
  0x1d   : > { %420 = vmatpush.bf16.msra.mxu1 %v411_v10  ;;  %v551_v11 = vsel %vm344_vm0, %v1025_v9, 0  ;;  %v1041_v12 = vld [vmem:[%s1321_s10 + $0x8] sm:$0xff]  ;;  %v1047_v13 = vld [vmem:[%s1321_s10 + $0x38] sm:$0xff]  ;;  %v1040_v14 = vld [vmem:[%s1321_s10] sm:$0xff]  ;;  %s762_s16 = scalar_lea.sflag [#allocation5], %s1519_s19  ;;  %s1127_s0 = sshra.s32 %s786_s11, 4  ;;  %s1128_s0 = int_to_ptr.hbm [resolvable:$true] %s1127_s0 }
  0x1e   : > { %560 = vmatpush.bf16.msra.mxu2 %v551_v11  ;;  %v1051_v15 = vld [vmem:[%s1321_s10 + $0x10] sm:$0xff]  ;;  %v1049_v17 = vld [vmem:[%s1321_s10 + $0x40] sm:$0xff]  ;;  %v1052_v18 = vld [vmem:[%s1321_s10 + $0x18] sm:$0xff]  ;;  %s1129_s17 = scalar_lea.hbm %s1128_s0, 8  ;;  %s1133_s27 = scalar_lea.hbm %s1573_s5, 32 }
  0x1f   : > { %964 = vmatmul.msk.bf16.vlgmr.msra.gmra.mxu0 %vm319_vm1, %v1041_v12  ;;  %970 = vmatmul.msk.bf16.vlgmr.msra.gmra.mxu3 %vm319_vm1, %v1047_v13  ;;  %v1042_v16 = vld [vmem:[%s1321_s10 + $0x10] sm:$0xff]  ;;  %v1043_v19 = vld [vmem:[%s1321_s10 + $0x18] sm:$0xff]  ;;  %v1053_v21 = vld [vmem:[%s1321_s10 + $0x20] sm:$0xff]  ;;  %p1130_p12 = scmp.ne.s32.totalorder %s1128_s0, %s1129_s17  ;;  %p1134_p1 = scmp.lt.s32.totalorder %s1128_s0, %s1573_s5 }
  0x20   : > { %1061 = vmatpush.bf16.msrb.mxu3 %v411_v10  ;;  %980 = vmatmul.msk.bf16.vlgmr.msra.gmra.mxu1 %vm319_vm1, %v1040_v14  ;;  %v1046_v20 = vld [vmem:[%s1321_s10 + $0x30] sm:$0xff]  ;;  %v1044_v22 = vld [vmem:[%s1321_s10 + $0x20] sm:$0xff]  ;;  %v1054_v23 = vld [vmem:[%s1321_s10 + $0x28] sm:$0xff]  ;;  %p1135_p2 = scmp.lt.s32.totalorder %s1133_s27, %s1129_s17 }
  0x21   : > { %1026 = vmatmul.msk.bf16.vlgmr.msra.gmra.mxu2 %vm319_vm1, %v1051_v15  ;;  %v1045_v24 = vld [vmem:[%s1321_s10 + $0x28] sm:$0xff]  ;;  %v1057_v25 = vld [vmem:[%s1321_s10 + $0x40] sm:$0xff]  ;;  %v1055_v26 = vld [vmem:[%s1321_s10 + $0x30] sm:$0xff]  ;;  %p1131_p13 = pnand %p1130_p12, %p1285_p5 }
  0x22   : > { %v1058_v27 = vld [vmem:[%s1321_s10 + $0x48] sm:$0xff]  ;;  %v1056_v28 = vld [vmem:[%s1321_s10 + $0x38] sm:$0xff]  ;;  %s783_s10 = sshll.u32 %s230_s30, 4  ;;  %p1136_p3 = por %p1135_p2, %p1134_p1  ;;  %s784_s10 = int_to_ptr.vmem [resolvable:$true] %s783_s10 }
  0x23   : > { %p1132_p0 = pneg %p1131_p13 }
  0x24   : > { %1062 = vmatpush.bf16.msra.mxu3 %v551_v11 }
  0x25   : > { %p1137_p4 = pnand %p1136_p3, %p1132_p0 }
  0x2f   : > { %965 = vmatmul.msk.bf16.gmra.mxu0 %vm319_vm1, %v1042_v16  ;;  %971 = vmatmul.msk.bf16.gmra.mxu3 %vm319_vm1, %v1049_v17 }
  0x30   : > { %981 = vmatmul.msk.bf16.gmra.mxu1 %vm319_vm1, %v1041_v12 }
  0x31   : > { %1027 = vmatmul.msk.bf16.gmra.mxu2 %vm319_vm1, %v1052_v18 }
  0x3f   : > { %966 = vmatmul.msk.bf16.gmra.mxu0 %vm319_vm1, %v1043_v19  ;;  %986 = vmatmul.msk.bf16.vlgmr.msrb.gmra.mxu3 %vm319_vm1, %v1046_v20 }
  0x40   : > { %982 = vmatmul.msk.bf16.gmra.mxu1 %vm319_vm1, %v1042_v16 }
  0x41   : > { %1028 = vmatmul.msk.bf16.gmra.mxu2 %vm319_vm1, %v1053_v21 }
  0x4f   : > { %967 = vmatmul.msk.bf16.gmra.mxu0 %vm319_vm1, %v1044_v22  ;;  %987 = vmatmul.msk.bf16.gmra.mxu3 %vm319_vm1, %v1047_v13 }
  0x50   : > { %983 = vmatmul.msk.bf16.gmra.mxu1 %vm319_vm1, %v1043_v19 }
  0x51   : > { %1029 = vmatmul.msk.bf16.gmra.mxu2 %vm319_vm1, %v1054_v23 }
  0x5f   : > { %968 = vmatmul.msk.bf16.gmra.mxu0 %vm319_vm1, %v1045_v24  ;;  %1032 = vmatmul.msk.bf16.vlgmr.msra.gmra.mxu3 %vm319_vm1, %v1057_v25 }
  0x60   : > { %984 = vmatmul.msk.bf16.gmra.mxu1 %vm319_vm1, %v1044_v22 }
  0x61   : > { %1030 = vmatmul.msk.bf16.gmra.mxu2 %vm319_vm1, %v1055_v26 }
  0x6f   : > { %969 = vmatmul.msk.bf16.gmra.mxu0 %vm319_vm1, %v1046_v20  ;;  %1033 = vmatmul.msk.bf16.gmra.mxu3 %vm319_vm1, %v1058_v27 }
  0x70   : > { %985 = vmatmul.msk.bf16.gmra.mxu1 %vm319_vm1, %v1045_v24 }
  0x71   : > { %1031 = vmatmul.msk.bf16.gmra.mxu2 %vm319_vm1, %v1056_v28 }
  0x9c   : > { %v357_v29 = vpop.f32.mrf.mxu0 }
  0x9d   : > { %v422_v30 = vpop.f32.mrf.mxu1 }
  0x9e   : > { %v423_v31 = vadd.f32 %v422_v30, %v357_v29 }
  0xa2   : > { %v1365_v32 = vpop.f32.mrf.mxu3 }
  0xa4   : > { %v562_v33 = vpop.f32.mrf.mxu2  ;;  %v359_v37 = vpop.f32.mrf.mxu0 }
  0xa5   : > { %v602_v35 = vadd.f32 %v562_v33, %v423_v31  ;;  %v424_v38 = vpop.f32.mrf.mxu1 }
  0xa6   : > { %v425_v41 = vadd.f32 %v424_v38, %v359_v37 }
  0xa7   : > { %v619_v39 = vmul.f32 %v1367_v34, %v602_v35 }
  0xa9   : > { %v1381_v40 = vadd.f32 %v1372_v36, %v619_v39 }
  0xaa   : > { %v1386_v42 = vpop.f32.mrf.mxu3 }
  0xab   : > { %656 = vst.msk [vmem:[%s1378_s18] sm:$0xff] %vm655_vm2, %v1381_v40 }
  0xac   : > { %v564_v43 = vpop.f32.mrf.mxu2  ;;  %v362_v45 = vpop.f32.mrf.mxu0 }
  0xad   : > { %v603_v44 = vadd.f32 %v564_v43, %v425_v41  ;;  %v427_v46 = vpop.f32.mrf.mxu1 }
  0xae   : > { %v428_v49 = vadd.f32 %v427_v46, %v362_v45 }
  0xaf   : > { %v620_v47 = vmul.f32 %v1367_v34, %v603_v44 }
  0xb1   : > { %v1390_v48 = vadd.f32 %v1372_v36, %v620_v47 }
  0xb2   : > { %v1395_v50 = vpop.f32.mrf.mxu3 }
  0xb3   : > { %657 = vst.msk [vmem:[%s1378_s18 + $0x8] sm:$0xff] %vm655_vm2, %v1390_v48 }
  0xb4   : > { %v567_v51 = vpop.f32.mrf.mxu2  ;;  %v364_v53 = vpop.f32.mrf.mxu0 }
  0xb5   : > { %v604_v52 = vadd.f32 %v567_v51, %v428_v49  ;;  %v429_v54 = vpop.f32.mrf.mxu1 }
  0xb6   : > { %v430_v57 = vadd.f32 %v429_v54, %v364_v53 }
  0xb7   : > { %v621_v55 = vmul.f32 %v1367_v34, %v604_v52 }
  0xb9   : > { %v1399_v56 = vadd.f32 %v1372_v36, %v621_v55 }
  0xba   : > { %v1404_v58 = vpop.f32.mrf.mxu3 }
  0xbb   : > { %658 = vst.msk [vmem:[%s1378_s18 + $0x10] sm:$0xff] %vm655_vm2, %v1399_v56 }
  0xbc   : > { %v569_v59 = vpop.f32.mrf.mxu2  ;;  %v367_v61 = vpop.f32.mrf.mxu0 }
  0xbd   : > { %v605_v60 = vadd.f32 %v569_v59, %v430_v57  ;;  %v432_v62 = vpop.f32.mrf.mxu1 }
  0xbe   : > { %v433_v1 = vadd.f32 %v432_v62, %v367_v61  ;;  %v672_v61 = vsel %vm655_vm2, %v1381_v40, inf  ;;  %v714_v62 = vsel %vm655_vm2, %v1381_v40, -inf  ;;  %v715_v40 = vsel %vm655_vm2, %v1390_v48, -inf }
  0xbf   : > { %v622_v63 = vmul.f32 %v1367_v34, %v605_v60 }
  0xc1   : > { %v1408_v0 = vadd.f32 %v1372_v36, %v622_v63 }
  0xc2   : > { %v452_v2 = vpop.f32.mrf.mxu3 }
  0xc3   : > { %659 = vst.msk [vmem:[%s1378_s18 + $0x18] sm:$0xff] %vm655_vm2, %v1408_v0  ;;  %v453_v37 = vadd.f32 %v452_v2, %v1365_v32 }
  0xc4   : > { %v572_v3 = vpop.f32.mrf.mxu2  ;;  %v369_v5 = vpop.f32.mrf.mxu0 }
  0xc5   : > { %v606_v4 = vadd.f32 %v572_v3, %v433_v1  ;;  %v434_v6 = vpop.f32.mrf.mxu1 }
  0xc6   : > { %v435_v9 = vadd.f32 %v434_v6, %v369_v5 }
  0xc7   : > { %v623_v7 = vmul.f32 %v1367_v34, %v606_v4 }
  0xc9   : > { %v643_v8 = vadd.f32 %v1372_v36, %v623_v7 }
  0xca   : > { %v454_v10 = vpop.f32.mrf.mxu3 }
  0xcb   : > { %660 = vst.msk [vmem:[%s1378_s18 + $0x20] sm:$0xff] %vm655_vm2, %v643_v8  ;;  %v455_v52 = vadd.f32 %v454_v10, %v1386_v42  ;;  %v676_v54 = vsel %vm655_vm2, %v643_v8, inf  ;;  %v718_v59 = vsel %vm655_vm2, %v643_v8, -inf }
  0xcc   : > { %v574_v11 = vpop.f32.mrf.mxu2  ;;  %v372_v13 = vpop.f32.mrf.mxu0  ;;  %v677_v2 = vmin.f32 %v672_v61, %v676_v54 }
  0xcd   : > { %v607_v12 = vadd.f32 %v574_v11, %v435_v9  ;;  %v437_v14 = vpop.f32.mrf.mxu1  ;;  %v719_v9 = vmax.f32 %v714_v62, %v718_v59  ;;  %v716_v59 = vsel %vm655_vm2, %v1399_v56, -inf }
  0xce   : > { %v438_v17 = vadd.f32 %v437_v14, %v372_v13 }
  0xcf   : > { %v624_v15 = vmul.f32 %v1367_v34, %v607_v12  ;;  %v673_v12 = vsel %vm655_vm2, %v1390_v48, inf }
  0xd1   : > { %v644_v16 = vadd.f32 %v1372_v36, %v624_v15 }
  0xd2   : > { %v457_v18 = vpop.f32.mrf.mxu3 }
  0xd3   : > { %661 = vst.msk [vmem:[%s1378_s18 + $0x28] sm:$0xff] %vm655_vm2, %v644_v16  ;;  %v720_v4 = vsel %vm655_vm2, %v644_v16, -inf  ;;  %v678_v6 = vsel %vm655_vm2, %v644_v16, inf  ;;  %v458_v14 = vadd.f32 %v457_v18, %v1395_v50 }
  0xd4   : > { %v577_v19 = vpop.f32.mrf.mxu2  ;;  %v374_v21 = vpop.f32.mrf.mxu0  ;;  %v679_v15 = vmin.f32 %v673_v12, %v678_v6  ;;  %v721_v16 = vmax.f32 %v715_v40, %v720_v4 }
  0xd5   : > { %v608_v20 = vadd.f32 %v577_v19, %v438_v17  ;;  %v439_v22 = vpop.f32.mrf.mxu1 }
  0xd6   : > { %v440_v25 = vadd.f32 %v439_v22, %v374_v21 }
  0xd7   : > { %v625_v23 = vmul.f32 %v1367_v34, %v608_v20 }
  0xd9   : > { %v1423_v24 = vadd.f32 %v1372_v36, %v625_v23 }
  0xda   : > { %v1428_v26 = vpop.f32.mrf.mxu3 }
  0xdb   : > { %662 = vst.msk [vmem:[%s1378_s18 + $0x30] sm:$0xff] %vm655_vm2, %v1423_v24  ;;  %v722_v54 = vsel %vm655_vm2, %v1423_v24, -inf }
  0xdc   : > { %v579_v27 = vpop.f32.mrf.mxu2  ;;  %v377_v29 = vpop.f32.mrf.mxu0 }
  0xdd   : > { %v609_v28 = vadd.f32 %v579_v27, %v440_v25  ;;  %v442_v30 = vpop.f32.mrf.mxu1 }
  0xde   : > { %v443_v35 = vadd.f32 %v442_v30, %v377_v29 }
  0xdf   : > { %v626_v31 = vmul.f32 %v1367_v34, %v609_v28 }
  0xe1   : > { %v1432_v33 = vadd.f32 %v1372_v36, %v626_v31 }
  0xe2   : > { %v592_v38 = vpop.f32.mrf.mxu3 }
  0xe3   : > { %663 = vst.msk [vmem:[%s1378_s18 + $0x38] sm:$0xff] %vm655_vm2, %v1432_v33  ;;  %v614_v41 = vadd.f32 %v592_v38, %v453_v37  ;;  %v682_v62 = vsel %vm655_vm2, %v1432_v33, inf }
  0xe4   : > { %v582_v39 = vpop.f32.mrf.mxu2  ;;  %v379_v44 = vpop.f32.mrf.mxu0 }
  0xe5   : > { %v610_v43 = vadd.f32 %v582_v39, %v443_v35  ;;  %v631_v45 = vmul.f32 %v1367_v34, %v614_v41  ;;  %v444_v46 = vpop.f32.mrf.mxu1 }
  0xe6   : > { %v445_v32 = vadd.f32 %v444_v46, %v379_v44 }
  0xe7   : > { %v627_v47 = vmul.f32 %v1367_v34, %v610_v43  ;;  %v651_v49 = vadd.f32 %v1372_v36, %v631_v45 }
  0xe9   : > { %v647_v51 = vadd.f32 %v1372_v36, %v627_v47  ;;  %668 = vst.msk [vmem:[%s1378_s18 + $0x60] sm:$0xff] %vm655_vm2, %v651_v49  ;;  %v692_v21 = vsel %vm655_vm2, %v651_v49, inf  ;;  %v734_v50 = vsel %vm655_vm2, %v651_v49, -inf  ;;  %v460_v49 = vadd.f32 %v1428_v26, %v1404_v58 }
  0xea   : > { %v594_v53 = vpop.f32.mrf.mxu3  ;;  %v724_v58 = vsel %vm655_vm2, %v1432_v33, -inf }
  0xeb   : > { %664 = vst.msk [vmem:[%s1378_s18 + $0x40] sm:$0xff] %vm655_vm2, %v647_v51  ;;  %v615_v57 = vadd.f32 %v594_v53, %v455_v52  ;;  %v684_v3 = vsel %vm655_vm2, %v647_v51, inf  ;;  %v726_v7 = vsel %vm655_vm2, %v647_v51, -inf }
  0xec   : > { %v584_v55 = vpop.f32.mrf.mxu2  ;;  %v382_v63 = vpop.f32.mrf.mxu0  ;;  %v685_v13 = vmin.f32 %v677_v2, %v684_v3  ;;  %v727_v17 = vmax.f32 %v719_v9, %v726_v7  ;;  %v723_v2 = vmax.f32 %v716_v59, %v722_v54  ;;  %v717_v3 = vsel %vm655_vm2, %v1408_v0, -inf }
  0xed   : > { %v611_v60 = vadd.f32 %v584_v55, %v445_v32  ;;  %v632_v42 = vmul.f32 %v1367_v34, %v615_v57  ;;  %v447_v1 = vpop.f32.mrf.mxu1  ;;  %v680_v57 = vsel %vm655_vm2, %v1423_v24, inf }
  0xee   : > { %v448_v11 = vadd.f32 %v447_v1, %v382_v63  ;;  %v693_v28 = vmin.f32 %v685_v13, %v692_v21  ;;  %v735_v37 = vmax.f32 %v727_v17, %v734_v50 }
  0xef   : > { %v628_v5 = vmul.f32 %v1367_v34, %v611_v60  ;;  %v652_v8 = vadd.f32 %v1372_v36, %v632_v42  ;;  %v674_v60 = vsel %vm655_vm2, %v1399_v56, inf  ;;  %v675_v56 = vsel %vm655_vm2, %v1408_v0, inf }
  0xf0   : > { %v681_v1 = vmin.f32 %v674_v60, %v680_v57 }
  0xf1   : > { %v648_v10 = vadd.f32 %v1372_v36, %v628_v5  ;;  %669 = vst.msk [vmem:[%s1378_s18 + $0x68] sm:$0xff] %vm655_vm2, %v652_v8  ;;  %v694_v29 = vsel %vm655_vm2, %v652_v8, inf  ;;  %v736_v30 = vsel %vm655_vm2, %v652_v8, -inf  ;;  %v725_v5 = vmax.f32 %v717_v3, %v724_v58 }
  0xf2   : > { %v597_v19 = vpop.f32.mrf.mxu3 }
  0xf3   : > { %665 = vst.msk [vmem:[%s1378_s18 + $0x48] sm:$0xff] %vm655_vm2, %v648_v10  ;;  %v686_v20 = vsel %vm655_vm2, %v648_v10, inf  ;;  %v728_v22 = vsel %vm655_vm2, %v648_v10, -inf  ;;  %v616_v25 = vadd.f32 %v597_v19, %v458_v14 }
  0xf4   : > { %v587_v23 = vpop.f32.mrf.mxu2  ;;  %v687_v48 = vmin.f32 %v679_v15, %v686_v20  ;;  %v729_v27 = vmax.f32 %v721_v16, %v728_v22  ;;  %v384_v43 = vpop.f32.mrf.mxu0 }
  0xf5   : > { %v612_v18 = vadd.f32 %v587_v23, %v448_v11  ;;  %v633_v31 = vmul.f32 %v1367_v34, %v616_v25  ;;  %v449_v44 = vpop.f32.mrf.mxu1 }
  0xf6   : > { %v695_v35 = vmin.f32 %v687_v48, %v694_v29  ;;  %v737_v38 = vmax.f32 %v729_v27, %v736_v30  ;;  %v450_v51 = vadd.f32 %v449_v44, %v384_v43 }
  0xf7   : > { %v629_v39 = vmul.f32 %v1367_v34, %v612_v18  ;;  %v653_v41 = vadd.f32 %v1372_v36, %v633_v31 }
  0xf8   : > { %v700_v45 = vmin.f32 %v693_v28, %v695_v35  ;;  %v742_v46 = vmax.f32 %v735_v37, %v737_v38 }
  0xf9   : > { %v649_v47 = vadd.f32 %v1372_v36, %v629_v39  ;;  %670 = vst.msk [vmem:[%s1378_s18 + $0x70] sm:$0xff] %vm655_vm2, %v653_v41  ;;  %v696_v10 = vsel %vm655_vm2, %v653_v41, inf  ;;  %v738_v0 = vsel %vm655_vm2, %v653_v41, -inf }
  0xfa   : > { %v599_v52 = vpop.f32.mrf.mxu3 }
  0xfb   : > { %666 = vst.msk [vmem:[%s1378_s18 + $0x50] sm:$0xff] %vm655_vm2, %v649_v47  ;;  %v617_v53 = vadd.f32 %v599_v52, %v460_v49  ;;  %v688_v42 = vsel %vm655_vm2, %v649_v47, inf  ;;  %v730_v24 = vsel %vm655_vm2, %v649_v47, -inf }
  0xfc   : > { %v589_v32 = vpop.f32.mrf.mxu2  ;;  %v689_v33 = vmin.f32 %v681_v1, %v688_v42  ;;  %v731_v6 = vmax.f32 %v723_v2, %v730_v24 }
  0xfd   : > { %v613_v55 = vadd.f32 %v589_v32, %v450_v51  ;;  %v634_v26 = vmul.f32 %v1367_v34, %v617_v53 }
  0xfe   : > { %v697_v12 = vmin.f32 %v689_v33, %v696_v10  ;;  %v739_v14 = vmax.f32 %v731_v6, %v738_v0 }
  0xff   : > { %v630_v61 = vmul.f32 %v1367_v34, %v613_v55  ;;  %v654_v63 = vadd.f32 %v1372_v36, %v634_v26  ;;  %v683_v34 = vmin.f32 %v675_v56, %v682_v62 }
 0x101   : > { %v650_v4 = vadd.f32 %v1372_v36, %v630_v61  ;;  %671 = vst.msk [vmem:[%s1378_s18 + $0x78] sm:$0xff] %vm655_vm2, %v654_v63  ;;  %v698_v36 = vsel %vm655_vm2, %v654_v63, inf  ;;  %v740_v11 = vsel %vm655_vm2, %v654_v63, -inf }
 0x103   : > { %667 = vst.msk [vmem:[%s1378_s18 + $0x58] sm:$0xff] %vm655_vm2, %v650_v4  ;;  %v690_v7 = vsel %vm655_vm2, %v650_v4, inf  ;;  %v732_v40 = vsel %vm655_vm2, %v650_v4, -inf }
 0x104   : > { %v691_v8 = vmin.f32 %v683_v34, %v690_v7  ;;  %v733_v9 = vmax.f32 %v725_v5, %v732_v40 }
 0x106   : > { %v699_v13 = vmin.f32 %v691_v8, %v698_v36  ;;  %v741_v15 = vmax.f32 %v733_v9, %v740_v11 }
 0x108   : > { %v701_v16 = vmin.f32 %v697_v12, %v699_v13  ;;  %v743_v17 = vmax.f32 %v739_v14, %v741_v15 }
 0x10a   : > { %v702_v19 = vmin.f32 %v700_v45, %v701_v16  ;;  %v744_v20 = vmax.f32 %v742_v46, %v743_v17 }
 0x10c   : > { %703 = vmin.xlane.f32.xlu0 %v702_v19 }
 0x114   : > { %745 = vmax.xlane.f32.xlu0 %v744_v20 }
 0x17f   : > { %v704_v21 = vpop.xlane.xlu0 %703 }
 0x180   : > { %v705_v22 = vrot.slane %v704_v21, 4 }
 0x182   : > { %v706_v23 = vmin.f32 %v704_v21, %v705_v22 }
 0x184   : > { %v707_v25 = vrot.slane %v706_v23, 2 }
 0x186   : > { %v708_v48 = vmin.f32 %v706_v23, %v707_v25 }
 0x187   : > { %v746_v27 = vpop.xlane.xlu0 %745 }
 0x188   : > { %v747_v50 = vrot.slane %v746_v27, 4  ;;  %v709_v18 = vrot.slane %v708_v48, 1 }
 0x18a   : > { %v748_v28 = vmax.f32 %v746_v27, %v747_v50  ;;  %v710_v29 = vmin.f32 %v708_v48, %v709_v18 }
 0x18c   : > { %v749_v30 = vrot.slane %v748_v28, 2  ;;  %1064 = vpush %v710_v29 }
 0x18e   : > { %v750_v31 = vmax.f32 %v748_v28, %v749_v30 }
 0x190   : > { %v751_v35 = vrot.slane %v750_v31, 1 }
 0x192   : > { %v752_v37 = vmax.f32 %v750_v31, %v751_v35 }
 0x194   : > { %1066 = vpush %v752_v37 }
 0x1bd   : > { %s1065_s12 = spop %1064 }
 0x1be   : > { %v712_v38 = vstv %s1065_s12 }
 0x1bf   : > { %713 = vst [vmem:[%s230_s30] sm:$0xff] %v712_v38 }
 0x1c0   : > { %1140 = shalt.err (!%p1137_p4)
}
 0x1c1   : > { %1068 = dma.vmem_to_hbm [thread:$0]  (%p1285_p5), %s784_s10, 128, %s786_s11, %s762_s16  }
 0x1c2   : > { %s237_s20 = scalar_lea.vmem [#allocation6], %s921_s21  ;;  %s799_s12 = sshll.u32 %s795_s15, 4  ;;  %s800_s12 = int_to_ptr.hbm [resolvable:$true] %s799_s12 }
 0x1c3   : > { %s797_s30 = sshll.u32 %s237_s20, 4  ;;  %s767_s14 = scalar_lea.sflag [#allocation7], %s1519_s19  ;;  %s798_s30 = int_to_ptr.vmem [resolvable:$true] %s797_s30 }
 0x1c4   : > { %s1155_s1 = sshra.s32 %s800_s12, 4  ;;  %s1161_s10 = scalar_lea.hbm %s1574_s6, 32  ;;  %s1156_s1 = int_to_ptr.hbm [resolvable:$true] %s1155_s1 }
 0x1c5   : > { %s1067_s13 = spop %1066  ;;  %s1157_s0 = scalar_lea.hbm %s1156_s1, 8 }
 0x1c6   : > { %v754_v39 = vstv %s1067_s13  ;;  %p1158_p7 = scmp.ne.s32.totalorder %s1156_s1, %s1157_s0  ;;  %p1162_p10 = scmp.lt.s32.totalorder %s1156_s1, %s1574_s6 }
 0x1c7   : > { %755 = vst [vmem:[%s237_s20] sm:$0xff] %v754_v39  ;;  %p1163_p11 = scmp.lt.s32.totalorder %s1161_s10, %s1157_s0 }
 0x1c8   : > { %p1159_p8 = pnand %p1158_p7, %p1285_p5 }
 0x1c9   : > { %p1164_p12 = por %p1163_p11, %p1162_p10 }
 0x1ca   : > { %p1160_p9 = pneg %p1159_p8 }
 0x1cc   : > { %p1165_p13 = pnand %p1164_p12, %p1160_p9 }
 0x1ce   : > { %1168 = shalt.err (!%p1165_p13)
}
 0x1cf   : > { %1069 = dma.vmem_to_hbm [thread:$0]  (%p1285_p5), %s798_s30, 128, %s800_s12, %s767_s14  }
 0x1d0 PF: > { %p1079_p0 = scmp.ge.s32.totalorder %s1207_s26, 2  ;;  %s819_s19 = sand.u32 1, %s1195_s23  }
 0x1d1   : > { %s820_s15 = scalar_lea.sflag [#allocation5], %s819_s19 }
 0x1d2   : > { %p1073_p1 = pnand %p1079_p0, %p1289_p6 }
 0x1d4   : > { %p1074_p2 = pneg %p1073_p1 }
 0x1d6   : > { %1186 = dma.done.wait (%p1074_p2), %s820_s15, 128  }
 0x1d7   : > { %1188 = vsyncadd (%p1074_p2), %s820_s15, 4294967168  ;;  %s830_s16 = scalar_lea.sflag [#allocation7], %s819_s19 }
 0x1d8   : > { %1190 = dma.done.wait (%p1074_p2), %s830_s16, 128  }
 0x1d9   : > { %1192 = vsyncadd (%p1074_p2), %s830_s16, 4294967168  ;;  %p21_p5 = scmp.ge.s32.totalorder %s1272_s28, 6   ;;  %s1579_s23 = smov %s1199_s24 }
 0x1da   : > { %s1580_s24 = smov %s1203_s25  ;;  %s1581_s25 = smov %s1283_s7 }
 0x1db   : > { %s1582_s26 = smov %s1272_s28  ;;  %23 = sbr.rel (!%p21_p5) target bundleno = 8 (0x8), region = 98 }
 0x1e0   :  { %836 = vsyncpa [#allocation5], 1 }
 0x1e1   :  { %838 = vsyncpa [#allocation5 + $0x1], 1 }
 0x1e2   :  { %839 = vsyncpa [#allocation7], 1 }
 0x1e3   :  { %841 = vsyncpa [#allocation7 + $0x1], 1 }

</bundles_post_ra>
